<compile_context>
chip_gen: v5e
topology: v5e:2x2
jax: 0.10.0
libtpu: 0.0.40
codegen_flags: <defaults>
</compile_context>

<pallas_src>
import numpy as np
import jax
import jax.numpy as jnp
from jax.experimental import pallas as pl
from jax.experimental.pallas import tpu as pltpu

V = 128                    # synthetic vertex count (real SMPL: 6890)
NJ = 24                    # joints
V3 = V * 3                 # 384  (multiple of 128 -> lane aligned)
F_POSE = (NJ - 1) * 9      # 207 pose-blendshape features
N_OUT = 512                # packed output width: [verts_cm(384) | joints(72) | pad]
SMPL_PARENTS = np.array(
    [-1, 0, 0, 0, 1, 2, 3, 4, 5, 6, 7, 8, 9, 9, 9, 12, 13, 14, 16, 17, 18, 19, 20, 21],
    dtype=np.int32)


def _compute_levels(parents):
    depth = np.zeros(len(parents), dtype=np.int32)
    for i in range(1, len(parents)):
        depth[i] = depth[parents[i]] + 1
    return [np.nonzero(depth == d)[0] for d in range(int(depth.max()) + 1)]


KIN_LEVELS = _compute_levels(SMPL_PARENTS)   # 9 levels for the SMPL tree


# ----------------------------- Pallas kernels ------------------------------------

def _blend_kernel(betas_ref, pf_ref, sdirs_ref, pdirs_ref, bias_ref, out_ref):
    # out[:, 0:384]   = template_cm + betas @ sdirs_cm + pose_feat @ pdirs_cm (coord-major)
    # out[:, 384:456] = templ@Jreg  + betas @ (sdirs@Jreg)                    (rest joints)
    acc = jnp.dot(betas_ref[...], sdirs_ref[...], preferred_element_type=jnp.float32)
    acc = acc + jnp.dot(pf_ref[...], pdirs_ref[...], preferred_element_type=jnp.float32)
    out_ref[...] = acc + bias_ref[...]


def _skin_kernel(a_ref, wt_ref, vp_ref, out_ref):
    # a_ref : (B*12, NJ) bf16 — per batch, rows ordered [Rx|Ry|Rz columns, then transl],
    #         i.e. row (b*12 + c*3 + i) = coefficient of joint transform (scale+transl
    #         already folded in) for output coord i, input coord c; rows 9..11 = transl.
    # wt_ref: (NJ, V) bf16 lbs weights transposed (lane-dense over vertices)
    # vp_ref: (B, 3, V) f32 posed vertices, coord-major (lane-dense)
    T = jnp.dot(a_ref[...], wt_ref[...], preferred_element_type=jnp.float32)   # (B*12, V)
    Bv = vp_ref.shape[0]
    for b in range(Bv):                        # B is tiny & static: unrolled
        Tb = T[b * 12:(b + 1) * 12]            # (12, V)
        vb = vp_ref[b]                         # (3, V)
        out_ref[b] = (Tb[0:3] * vb[0:1] + Tb[3:6] * vb[1:2] +
                      Tb[6:9] * vb[2:3] + Tb[9:12])


# ----------------------------- plain-JAX glue -------------------------------------

def batch_rodrigues(rot_vecs):
    # rot_vecs: (N,3) axis-angle -> (N,3,3) rotation matrices (smplx convention)
    angle = jnp.linalg.norm(rot_vecs + 1e-8, axis=1, keepdims=True)          # (N,1)
    rot_dir = rot_vecs / angle
    cos = jnp.cos(angle)[:, :, None]
    sin = jnp.sin(angle)[:, :, None]
    rx, ry, rz = rot_dir[:, 0:1], rot_dir[:, 1:2], rot_dir[:, 2:3]
    zeros = jnp.zeros_like(rx)
    K = jnp.concatenate([zeros, -rz, ry, rz, zeros, -rx, -ry, rx, zeros],
                        axis=1).reshape(-1, 3, 3)
    ident = jnp.eye(3, dtype=rot_vecs.dtype)[None]
    return ident + sin * K + (1.0 - cos) * jnp.matmul(K, K)


def batch_rigid_transform(rot_mats, joints):
    # Level-batched kinematic chain: 9 batched 4x4 matmuls instead of 23 serial ones.
    B, J = joints.shape[:2]
    parents = SMPL_PARENTS
    rel_joints = joints.at[:, 1:].add(-joints[:, parents[1:]])
    tm = jnp.concatenate([rot_mats, rel_joints[..., None]], axis=-1)          # (B,J,3,4)
    bottom = jnp.broadcast_to(jnp.array([0., 0., 0., 1.], jnp.float32), (B, J, 1, 4))
    tm = jnp.concatenate([tm, bottom], axis=-2)                               # (B,J,4,4)
    transforms = jnp.zeros((B, J, 4, 4), jnp.float32)
    transforms = transforms.at[:, 0].set(tm[:, 0])
    for lvl in KIN_LEVELS[1:]:
        new = jnp.matmul(transforms[:, parents[lvl]], tm[:, lvl])
        transforms = transforms.at[:, lvl].set(new)
    posed_joints = transforms[:, :, :3, 3]
    corr = jnp.einsum('bjik,bjk->bji', transforms[:, :, :3, :3], joints)
    rel_transforms = transforms.at[:, :, :3, 3].add(-corr)
    return posed_joints, rel_transforms


def rigid_inverse(M):
    # closed-form inverse of rigid [R|t; 0 0 0 1] transforms (canonical scale == 1)
    R = M[..., :3, :3]
    t = M[..., :3, 3:4]
    Rt = jnp.swapaxes(R, -1, -2)
    top = jnp.concatenate([Rt, -jnp.matmul(Rt, t)], axis=-1)
    bottom = jnp.broadcast_to(jnp.array([0., 0., 0., 1.], jnp.float32),
                              M.shape[:-2] + (1, 4))
    return jnp.concatenate([top, bottom], axis=-2)


# ----------------------------- SMPLServer ------------------------------------------

class SMPLServerPallas:
    def __init__(self, gender='male', betas=None):
        key = jax.random.PRNGKey(0)
        k_t, k_s, k_p, k_j, k_w = jax.random.split(key, 5)
        self.v_template = (jax.random.normal(k_t, (V, 3)) * 0.3).astype(jnp.float32)
        shapedirs = (jax.random.normal(k_s, (V, 3, 10)) * 0.01).astype(jnp.float32)
        # synthetic posedirs generated directly in coord-major (F_POSE, 3, V) layout
        posedirs_cm = (jax.random.normal(k_p, (F_POSE, 3, V)) * 0.01).astype(jnp.float32)
        J_regressor = jax.nn.softmax(jax.random.normal(k_j, (NJ, V)), axis=-1).astype(jnp.float32)
        self.lbs_weights = jax.nn.softmax(jax.random.normal(k_w, (V, NJ)) * 2.0,
                                          axis=-1).astype(jnp.float32)
        self.lbs_weights_t_bf16 = jnp.transpose(self.lbs_weights).astype(jnp.bfloat16)

        self.bone_parents = SMPL_PARENTS.copy()
        self.bone_ids = [[int(self.bone_parents[i]), i] for i in range(NJ)]

        # ---- packed constant operands for the blend kernel (bf16, f32-accumulated) ----
        # columns 0:V3     -> coord-major vertex offsets  (col = c*V + v)
        # columns V3:V3+72 -> rest joints                  (col = j*3 + c)
        sdirs_cm = jnp.transpose(shapedirs, (2, 1, 0)).reshape(10, V3)         # (10, 384)
        pdirs_cm = posedirs_cm.reshape(F_POSE, V3)                             # (207, 384)
        jreg_fold = jnp.einsum('jv,vcs->sjc', J_regressor, shapedirs).reshape(10, NJ * 3)
        templ_cm = jnp.transpose(self.v_template, (1, 0)).reshape(1, V3)
        templ_jnt = jnp.einsum('jv,vc->jc', J_regressor, self.v_template).reshape(1, NJ * 3)

        sd = jnp.zeros((10, N_OUT), jnp.float32)
        sd = sd.at[:, 0:V3].set(sdirs_cm)
        sd = sd.at[:, V3:V3 + NJ * 3].set(jreg_fold)
        self.sdirs_rhs = sd.astype(jnp.bfloat16)                               # (10, 512)

        pdr = jnp.zeros((F_POSE, N_OUT), jnp.float32)
        pdr = pdr.at[:, 0:V3].set(pdirs_cm)
        self.pdirs_rhs = pdr.astype(jnp.bfloat16)                              # (207, 512)

        bias = jnp.zeros((1, N_OUT), jnp.float32)
        bias = bias.at[:, 0:V3].set(templ_cm)
        bias = bias.at[:, V3:V3 + NJ * 3].set(templ_jnt)
        self.bias_row = bias                                                   # (1, 512) f32

        pc = jnp.zeros((1, 86), jnp.float32)
        pc = pc.at[0, 0].set(1.0).at[0, 9].set(np.pi / 6).at[0, 12].set(-np.pi / 6)
        if betas is not None:
            pc = pc.at[0, -10:].set(jnp.asarray(betas, jnp.float32))
        self.param_canonical = pc

        # canonical-pose constants (thetas never change) precomputed once
        cano_rot = batch_rodrigues(pc[:, 4:76].reshape(-1, 3)).reshape(1, NJ, 3, 3)
        self.cano_rot_mats = cano_rot
        self.cano_pose_feat = (cano_rot[:, 1:] - jnp.eye(3, dtype=jnp.float32)
                               ).reshape(1, F_POSE)

        # jitted forward paths (kills per-op dispatch + intermediate HBM bounces)
        self._fwd_abs = jax.jit(lambda p: self._forward_impl(p, absolute=True))
        self._fwd_rel = jax.jit(lambda p: self._forward_impl(p, absolute=False))

        out_c = self.forward(pc, absolute=True)
        self.verts_c = out_c['smpl_verts']
        self.joints_c = out_c['smpl_jnts']
        self.tfs_c = out_c['smpl_tfs']
        self.tfs_c_inv = rigid_inverse(self.tfs_c[0])

        pc_d = pc.at[0, -10:].set(0.0)
        out_d = self.forward(pc_d, absolute=True)
        self.verts_c_deshaped = out_d['smpl_verts']
        self.joints_c_deshaped = out_d['smpl_jnts']
        self.tfs_c_deshaped = out_d['smpl_tfs']
        self.weights_c = out_d['smpl_weights']

    # ---- Pallas call wrappers ----

    def _blend(self, betas, pose_feat):
        B = betas.shape[0]
        out = pl.pallas_call(
            _blend_kernel,
            grid=(1,),
            in_specs=[
                pl.BlockSpec((B, 10), lambda i: (0, 0)),
                pl.BlockSpec((B, F_POSE), lambda i: (0, 0)),
                pl.BlockSpec((10, N_OUT), lambda i: (0, 0)),
                pl.BlockSpec((F_POSE, N_OUT), lambda i: (0, 0)),
                pl.BlockSpec((1, N_OUT), lambda i: (0, 0)),
            ],
            out_specs=pl.BlockSpec((B, N_OUT), lambda i: (0, 0)),
            out_shape=jax.ShapeDtypeStruct((B, N_OUT), jnp.float32),
            compiler_params=pltpu.CompilerParams(dimension_semantics=("arbitrary",)),
        )(betas.astype(jnp.bfloat16), pose_feat.astype(jnp.bfloat16),
          self.sdirs_rhs, self.pdirs_rhs, self.bias_row)

        v_posed_cm = out[:, :V3].reshape(B, 3, V)                 # coord-major, lane dense
        joints_rest = out[:, V3:V3 + NJ * 3].reshape(B, NJ, 3)
        return v_posed_cm, joints_rest

    def _skin(self, a12_bf16, v_posed_cm):
        B = v_posed_cm.shape[0]
        return pl.pallas_call(
            _skin_kernel,
            grid=(1,),
            in_specs=[
                pl.BlockSpec((B * 12, NJ), lambda i: (0, 0)),
                pl.BlockSpec((NJ, V), lambda i: (0, 0)),
                pl.BlockSpec((B, 3, V), lambda i: (0, 0, 0)),
            ],
            out_specs=pl.BlockSpec((B, 3, V), lambda i: (0, 0, 0)),
            out_shape=jax.ShapeDtypeStruct((B, 3, V), jnp.float32),
            compiler_params=pltpu.CompilerParams(dimension_semantics=("arbitrary",)),
        )(a12_bf16, self.lbs_weights_t_bf16, v_posed_cm)

    # ---- SMPL LBS core ----
    # Returns world-space verts (coord-major, scale+transl applied), world joints and
    # the scaled+translated bone transforms (== smpl_T before canonical composition).

    def _lbs_core(self, betas, rot_mats, pose_feat, scale, transl):
        B = betas.shape[0]
        v_posed_cm, joints_rest = self._blend(betas, pose_feat)
        posed_joints, rel_tfs = batch_rigid_transform(rot_mats, joints_rest)

        # fold scale + transl into the transforms (valid since lbs weights sum to 1)
        tf_mats = rel_tfs.at[:, :, :3, :].multiply(scale[:, :, None, None])
        tf_mats = tf_mats.at[:, :, :3, 3].add(transl[:, None, :])

        # pack the 12 useful rows, per-batch, column-major (c*3+i) then translation
        rot_ci = jnp.swapaxes(tf_mats[:, :, :3, :3], -1, -2)        # (B,NJ,3,3) [c,i]
        trn = tf_mats[:, :, :3, 3]                                  # (B,NJ,3)
        coef = jnp.concatenate([rot_ci.reshape(B, NJ, 9), trn], axis=-1)   # (B,NJ,12)
        a12 = jnp.transpose(coef, (0, 2, 1)).reshape(B * 12, NJ)

        verts_cm = self._skin(a12.astype(jnp.bfloat16), v_posed_cm)        # (B,3,V)
        joints = posed_joints * scale[:, None, :] + transl[:, None, :]
        return verts_cm, joints, tf_mats

    def _pack_output(self, verts_cm, joints, tf_mats, tf_rot, B):
        verts = jnp.transpose(verts_cm, (0, 2, 1))                   # (B,V,3)
        weights = jnp.broadcast_to(self.lbs_weights[None], (B, V, NJ))
        return {
            'smpl_verts': verts.astype(jnp.float32),
            'smpl_tfs': tf_mats,
            'smpl_weights': weights.astype(jnp.float32),
            'smpl_jnts': joints.astype(jnp.float32),
            'smpl_T': tf_rot.astype(jnp.float32),
        }

    # ---- SMPLServer.forward semantics (pure-JAX impl, traced under jit) ----

    def _forward_impl(self, smpl_params, absolute):
        B = smpl_params.shape[0]
        scale = smpl_params[:, 0:1]
        transl = smpl_params[:, 1:4]
        thetas = smpl_params[:, 4:76]
        betas = smpl_params[:, 76:86]

        rot_mats = batch_rodrigues(thetas.reshape(-1, 3)).reshape(B, NJ, 3, 3)
        pose_feat = (rot_mats[:, 1:] - jnp.eye(3, dtype=jnp.float32)).reshape(B, F_POSE)
        verts_cm, joints, tf_mats = self._lbs_core(betas, rot_mats, pose_feat, scale, transl)
        tf_rot = tf_mats

        output = {}
        if not absolute:
            # canonical pass: precomputed canonical rotations / pose_feat, scale=1, transl=0
            cano_rot = jnp.broadcast_to(self.cano_rot_mats, (B, NJ, 3, 3))
            cano_pf = jnp.broadcast_to(self.cano_pose_feat, (B, F_POSE))
            ones = jnp.ones((B, 1), jnp.float32)
            zeros = jnp.zeros((B, 3), jnp.float32)
            verts_c_cm, joints_c, tfs_c = self._lbs_core(betas, cano_rot, cano_pf, ones, zeros)
            out_cano = self._pack_output(verts_c_cm, joints_c, tfs_c, tfs_c, B)
            output.update({k + '_cano': v for k, v in out_cano.items()})
            tfs_c_inv = rigid_inverse(tfs_c)                 # closed-form (canonical scale == 1)
            tf_mats = jnp.einsum('bnij,bnjk->bnik', tf_mats, tfs_c_inv)

        output.update(self._pack_output(verts_cm, joints, tf_mats, tf_rot, B))
        return output

    def forward(self, smpl_params, displacement=None, v_template=None, absolute=False):
        p = jnp.asarray(smpl_params, jnp.float32)
        if v_template is not None:
            p = p.at[:, 76:86].set(0.0)
            # TODO(synk): custom v_template mesh override not wired into the synthetic template.
        # TODO(synk): per-vertex displacement not wired in (checkpoint-dependent in original SMPL).
        return self._fwd_abs(p) if absolute else self._fwd_rel(p)


# ----------------------------- demo -------------------------------------------------

if __name__ == "__main__":
    server = SMPLServerPallas()

    key = jax.random.PRNGKey(0)
    k1, k2, k3 = jax.random.split(key, 3)
    B = 2
    params = jnp.zeros((B, 86), jnp.float32)
    params = params.at[:, 0].set(1.0)                                    # scale
    params = params.at[:, 1:4].set(jax.random.normal(k1, (B, 3)) * 0.1)  # transl
    params = params.at[:, 4:76].set(jax.random.normal(k2, (B, 72)) * 0.2)   # thetas
    params = params.at[:, 76:86].set(jax.random.normal(k3, (B, 10)) * 0.5)  # betas

    out = server.forward(params, absolute=False)

    jax.block_until_ready(out['smpl_verts'])
    jax.block_until_ready(out['smpl_tfs'])
    jax.block_until_ready(out['smpl_jnts'])

    assert out['smpl_verts'].shape == (B, V, 3)
    assert out['smpl_tfs'].shape == (B, NJ, 4, 4)
    assert out['smpl_jnts'].shape == (B, NJ, 3)
    assert out['smpl_weights'].shape == (B, V, NJ)
    assert out['smpl_verts_cano'].shape == (B, V, 3)
    assert bool(jnp.all(jnp.isfinite(out['smpl_verts'])))
    assert bool(jnp.all(jnp.isfinite(out['smpl_tfs'])))
    assert bool(jnp.all(jnp.isfinite(out['smpl_verts_cano'])))
    print("KERNEL_OK")
</pallas_src>

<mosaic_0001>
module attributes {stable_mosaic.version = 11 : i64} {
  func.func @_blend_kernel(%arg0: i32, %arg1: memref<1x10xbf16, #tpu.memory_space<vmem>>, %arg2: memref<1x207xbf16, #tpu.memory_space<vmem>>, %arg3: memref<10x512xbf16, #tpu.memory_space<vmem>>, %arg4: memref<207x512xbf16, #tpu.memory_space<vmem>>, %arg5: memref<1x512xf32, #tpu.memory_space<vmem>>, %arg6: memref<1x512xf32, #tpu.memory_space<vmem>>) attributes {dimension_semantics = [#tpu.dimension_semantics<arbitrary>], iteration_bounds = array<i64: 1>, scalar_prefetch = 0 : i64, scratch_operands = 0 : i64, tpu.core_type = #tpu.core_type<tc>, window_params = [{pipeline_mode = #tpu.pipeline_mode<synchronous>, transform_indices = @transform_0, window_bounds = array<i64: 1, 10>}, {pipeline_mode = #tpu.pipeline_mode<synchronous>, transform_indices = @transform_1, window_bounds = array<i64: 1, 207>}, {pipeline_mode = #tpu.pipeline_mode<synchronous>, transform_indices = @transform_2, window_bounds = array<i64: 10, 512>}, {pipeline_mode = #tpu.pipeline_mode<synchronous>, transform_indices = @transform_3, window_bounds = array<i64: 207, 512>}, {pipeline_mode = #tpu.pipeline_mode<synchronous>, transform_indices = @transform_4, window_bounds = array<i64: 1, 512>}, {pipeline_mode = #tpu.pipeline_mode<synchronous>, transform_indices = @transform_5, window_bounds = array<i64: 1, 512>}]} {
    %c0 = arith.constant 0 : index
    %c0_0 = arith.constant 0 : index
    %0 = vector.load %arg1[%c0, %c0_0] : memref<1x10xbf16, #tpu.memory_space<vmem>>, vector<1x10xbf16>
    %c0_1 = arith.constant 0 : index
    %c0_2 = arith.constant 0 : index
    %1 = vector.load %arg3[%c0_1, %c0_2] : memref<10x512xbf16, #tpu.memory_space<vmem>>, vector<10x512xbf16>
    %cst = arith.constant dense<0.000000e+00> : vector<1x512xf32>
    %2 = tpu.matmul %0, %1, %cst {dimension_numbers = #tpu.dot_dimension_numbers<[1], [0], [0], [1], [0, 0, 1, 1], [], []>} : vector<1x10xbf16>, vector<10x512xbf16>, vector<1x512xf32> -> vector<1x512xf32>
    %c0_3 = arith.constant 0 : index
    %c0_4 = arith.constant 0 : index
    %3 = vector.load %arg2[%c0_3, %c0_4] : memref<1x207xbf16, #tpu.memory_space<vmem>>, vector<1x207xbf16>
    %c0_5 = arith.constant 0 : index
    %c0_6 = arith.constant 0 : index
    %4 = vector.load %arg4[%c0_5, %c0_6] : memref<207x512xbf16, #tpu.memory_space<vmem>>, vector<207x512xbf16>
    %cst_7 = arith.constant dense<0.000000e+00> : vector<1x512xf32>
    %5 = tpu.matmul %3, %4, %cst_7 {dimension_numbers = #tpu.dot_dimension_numbers<[1], [0], [0], [1], [0, 0, 1, 1], [], []>} : vector<1x207xbf16>, vector<207x512xbf16>, vector<1x512xf32> -> vector<1x512xf32>
    %6 = arith.addf %2, %5 : vector<1x512xf32>
    %c0_8 = arith.constant 0 : index
    %c0_9 = arith.constant 0 : index
    %7 = vector.load %arg5[%c0_8, %c0_9] : memref<1x512xf32, #tpu.memory_space<vmem>>, vector<1x512xf32>
    %8 = arith.addf %6, %7 : vector<1x512xf32>
    %c0_10 = arith.constant 0 : index
    %c0_11 = arith.constant 0 : index
    %9 = vector.load %arg6[%c0_10, %c0_11] : memref<1x512xf32, #tpu.memory_space<vmem>>, vector<1x512xf32>
    tpu.vector_store %arg6[%c0_10, %c0_11], %8 {strides = array<i32>} : memref<1x512xf32, #tpu.memory_space<vmem>>, vector<1x512xf32>,
    return
  }
  func.func @transform_0(%arg0: i32) -> (i32, i32) {
    %c0_i32 = arith.constant 0 : i32
    %c0_i32_0 = arith.constant 0 : i32
    %c0_i32_1 = arith.constant 0 : i32
    return %c0_i32, %c0_i32_0 : i32, i32
  }
  func.func @transform_1(%arg0: i32) -> (i32, i32) {
    %c0_i32 = arith.constant 0 : i32
    %c0_i32_0 = arith.constant 0 : i32
    %c0_i32_1 = arith.constant 0 : i32
    return %c0_i32, %c0_i32_0 : i32, i32
  }
  func.func @transform_2(%arg0: i32) -> (i32, i32) {
    %c0_i32 = arith.constant 0 : i32
    %c0_i32_0 = arith.constant 0 : i32
    %c0_i32_1 = arith.constant 0 : i32
    return %c0_i32, %c0_i32_0 : i32, i32
  }
  func.func @transform_3(%arg0: i32) -> (i32, i32) {
    %c0_i32 = arith.constant 0 : i32
    %c0_i32_0 = arith.constant 0 : i32
    %c0_i32_1 = arith.constant 0 : i32
    return %c0_i32, %c0_i32_0 : i32, i32
  }
  func.func @transform_4(%arg0: i32) -> (i32, i32) {
    %c0_i32 = arith.constant 0 : i32
    %c0_i32_0 = arith.constant 0 : i32
    %c0_i32_1 = arith.constant 0 : i32
    return %c0_i32, %c0_i32_0 : i32, i32
  }
  func.func @transform_5(%arg0: i32) -> (i32, i32) {
    %c0_i32 = arith.constant 0 : i32
    %c0_i32_0 = arith.constant 0 : i32
    %c0_i32_1 = arith.constant 0 : i32
    return %c0_i32, %c0_i32_0 : i32, i32
  }
}

module attributes {stable_mosaic.version = 11 : i64} {
  func.func @_skin_kernel(%arg0: i32, %arg1: memref<12x24xbf16, #tpu.memory_space<vmem>>, %arg2: memref<24x128xbf16, #tpu.memory_space<vmem>>, %arg3: memref<1x3x128xf32, #tpu.memory_space<vmem>>, %arg4: memref<1x3x128xf32, #tpu.memory_space<vmem>>) attributes {dimension_semantics = [#tpu.dimension_semantics<arbitrary>], iteration_bounds = array<i64: 1>, scalar_prefetch = 0 : i64, scratch_operands = 0 : i64, tpu.core_type = #tpu.core_type<tc>, window_params = [{pipeline_mode = #tpu.pipeline_mode<synchronous>, transform_indices = @transform_0, window_bounds = array<i64: 12, 24>}, {pipeline_mode = #tpu.pipeline_mode<synchronous>, transform_indices = @transform_1, window_bounds = array<i64: 24, 128>}, {pipeline_mode = #tpu.pipeline_mode<synchronous>, transform_indices = @transform_2, window_bounds = array<i64: 1, 3, 128>}, {pipeline_mode = #tpu.pipeline_mode<synchronous>, transform_indices = @transform_3, window_bounds = array<i64: 1, 3, 128>}]} {
    %c0 = arith.constant 0 : index
    %c0_0 = arith.constant 0 : index
    %0 = vector.load %arg1[%c0, %c0_0] : memref<12x24xbf16, #tpu.memory_space<vmem>>, vector<12x24xbf16>
    %c0_1 = arith.constant 0 : index
    %c0_2 = arith.constant 0 : index
    %1 = vector.load %arg2[%c0_1, %c0_2] : memref<24x128xbf16, #tpu.memory_space<vmem>>, vector<24x128xbf16>
    %cst = arith.constant dense<0.000000e+00> : vector<12x128xf32>
    %2 = tpu.matmul %0, %1, %cst {dimension_numbers = #tpu.dot_dimension_numbers<[1], [0], [0], [1], [0, 0, 1, 1], [], []>} : vector<12x24xbf16>, vector<24x128xbf16>, vector<12x128xf32> -> vector<12x128xf32>
    %c0_3 = arith.constant 0 : index
    %c0_4 = arith.constant 0 : index
    %c0_5 = arith.constant 0 : index
    %3 = vector.load %arg3[%c0_3, %c0_4, %c0_5] : memref<1x3x128xf32, #tpu.memory_space<vmem>>, vector<1x3x128xf32>
    %4 = vector.shape_cast %3 : vector<1x3x128xf32> to vector<3x128xf32>
    %5 = vector.extract_strided_slice %2 {offsets = [0, 0], sizes = [3, 128], strides = [1, 1]} : vector<12x128xf32> to vector<3x128xf32>
    %6 = vector.extract_strided_slice %4 {offsets = [0, 0], sizes = [1, 128], strides = [1, 1]} : vector<3x128xf32> to vector<1x128xf32>
    %7 = vector.broadcast %6 : vector<1x128xf32> to vector<3x128xf32>
    %8 = arith.mulf %5, %7 : vector<3x128xf32>
    %9 = vector.extract_strided_slice %2 {offsets = [3, 0], sizes = [3, 128], strides = [1, 1]} : vector<12x128xf32> to vector<3x128xf32>
    %10 = vector.extract_strided_slice %4 {offsets = [1, 0], sizes = [1, 128], strides = [1, 1]} : vector<3x128xf32> to vector<1x128xf32>
    %11 = vector.broadcast %10 : vector<1x128xf32> to vector<3x128xf32>
    %12 = arith.mulf %9, %11 : vector<3x128xf32>
    %13 = arith.addf %8, %12 : vector<3x128xf32>
    %14 = vector.extract_strided_slice %2 {offsets = [6, 0], sizes = [3, 128], strides = [1, 1]} : vector<12x128xf32> to vector<3x128xf32>
    %15 = vector.extract_strided_slice %4 {offsets = [2, 0], sizes = [1, 128], strides = [1, 1]} : vector<3x128xf32> to vector<1x128xf32>
    %16 = vector.broadcast %15 : vector<1x128xf32> to vector<3x128xf32>
    %17 = arith.mulf %14, %16 : vector<3x128xf32>
    %18 = arith.addf %13, %17 : vector<3x128xf32>
    %19 = vector.extract_strided_slice %2 {offsets = [9, 0], sizes = [3, 128], strides = [1, 1]} : vector<12x128xf32> to vector<3x128xf32>
    %20 = arith.addf %18, %19 : vector<3x128xf32>
    %c0_6 = arith.constant 0 : index
    %c0_7 = arith.constant 0 : index
    %c0_8 = arith.constant 0 : index
    %21 = vector.load %arg4[%c0_6, %c0_7, %c0_8] : memref<1x3x128xf32, #tpu.memory_space<vmem>>, vector<1x3x128xf32>
    %22 = vector.shape_cast %21 : vector<1x3x128xf32> to vector<3x128xf32>
    %23 = vector.shape_cast %20 : vector<3x128xf32> to vector<1x3x128xf32>
    tpu.vector_store %arg4[%c0_6, %c0_7, %c0_8], %23 {strides = array<i32>} : memref<1x3x128xf32, #tpu.memory_space<vmem>>, vector<1x3x128xf32>,
    return
  }
  func.func @transform_0(%arg0: i32) -> (i32, i32) {
    %c0_i32 = arith.constant 0 : i32
    %c0_i32_0 = arith.constant 0 : i32
    %c0_i32_1 = arith.constant 0 : i32
    return %c0_i32, %c0_i32_0 : i32, i32
  }
  func.func @transform_1(%arg0: i32) -> (i32, i32) {
    %c0_i32 = arith.constant 0 : i32
    %c0_i32_0 = arith.constant 0 : i32
    %c0_i32_1 = arith.constant 0 : i32
    return %c0_i32, %c0_i32_0 : i32, i32
  }
  func.func @transform_2(%arg0: i32) -> (i32, i32, i32) {
    %c0_i32 = arith.constant 0 : i32
    %c0_i32_0 = arith.constant 0 : i32
    %c0_i32_1 = arith.constant 0 : i32
    %c0_i32_2 = arith.constant 0 : i32
    return %c0_i32, %c0_i32_0, %c0_i32_1 : i32, i32, i32
  }
  func.func @transform_3(%arg0: i32) -> (i32, i32, i32) {
    %c0_i32 = arith.constant 0 : i32
    %c0_i32_0 = arith.constant 0 : i32
    %c0_i32_1 = arith.constant 0 : i32
    %c0_i32_2 = arith.constant 0 : i32
    return %c0_i32, %c0_i32_0, %c0_i32_1 : i32, i32, i32
  }
}

</mosaic_0001>

<bundles_post_ra>
// kernel: _lambda_.2
= control target key start
LH: loop header
LB: loop body
LE: loop exit
PB: predicated region body
PF: predicated region fallthrough
CT: control target
= control target key end

     0   :  { %vm343_vm0 = vcmask 1046528   ;;  %vm344_vm1 = vcmask 1047552   ;;  %v874_v9 = vmov 65535   ;;  %vm340_vm2 = vcmask 646144   ;;  %s1279_s3 = inlined_call_operand.vmem [shape: bf16[207,512], index: 3, kind: input, shape index: {}]   ;;  %s1280_s1 = inlined_call_operand.vmem [shape: bf16[1,207], index: 1, kind: input, shape index: {}]   ;;  %s1281_s2 = inlined_call_operand.vmem [shape: bf16[10,512], index: 2, kind: input, shape index: {}]   ;;  %s1282_s0 = inlined_call_operand.vmem [shape: bf16[1,10], index: 0, kind: input, shape index: {}]   ;;  %s1283_s4 = inlined_call_operand.vmem [shape: f32[1,512], index: 4, kind: input, shape index: {}]   ;;  %s1284_s5 = inlined_call_operand.vmem [shape: f32[1,512], index: 5, kind: output, shape index: {}]  }
   0x1   :  { %v699_v0 = vld [vmem:[%s1279_s3 + $0xe0] sm:$0xf]  ;;  %v851_v1 = vld [vmem:[%s1279_s3 + $0xec] sm:$0xf0]  ;;  %v849_v2 = vld [vmem:[%s1279_s3 + $0xe4] sm:$0xf] }
   0x2   :  { %v700_v3 = vor.u32 %v851_v1, %v699_v0  ;;  %v701_v4 = vld [vmem:[%s1279_s3 + $0xf0] sm:$0xf0]  ;;  %v779_v5 = vld [vmem:[%s1279_s3 + $0x180] sm:$0xf]  ;;  %v871_v6 = vld [vmem:[%s1279_s3 + $0x18c] sm:$0xf0] }
   0x3   :  { %v704_v7 = vor.u32 %v849_v2, %v701_v4  ;;  %v780_v8 = vor.u32 %v871_v6, %v779_v5  ;;  %v345_v10 = vsel %vm343_vm0, 4294967295, %v874_v9  ;;  %v869_v11 = vld [vmem:[%s1279_s3 + $0x184] sm:$0xf]  ;;  %v781_v12 = vld [vmem:[%s1279_s3 + $0x190] sm:$0xf0]  ;;  %vm483_vm3 = vcmask 1044480  }
   0x4   :  { %359 = vmatpush.bf16.msra.mxu0 %v700_v3  ;;  %v929_v13 = vsel %vm344_vm1, %v345_v10, 0  ;;  %v784_v14 = vor.u32 %v869_v11, %v781_v12  ;;  %v683_v15 = vld [vmem:[%s1279_s3 + $0xc0] sm:$0xf]  ;;  %v847_v16 = vld [vmem:[%s1279_s3 + $0xcc] sm:$0xf0]  ;;  %vm479_vm4 = vcmask 80896  }
   0x5   :  { %385 = vmatpush.bf16.msra.mxu2 %v704_v7  ;;  %v348_v17 = vand.u32 %v780_v8, %v929_v13  ;;  %v684_v18 = vor.u32 %v847_v16, %v683_v15  ;;  %v845_v19 = vld [vmem:[%s1279_s3 + $0xc4] sm:$0xf]  ;;  %v685_v20 = vld [vmem:[%s1279_s3 + $0xd0] sm:$0xf0]  ;;  %v763_v21 = vld [vmem:[%s1279_s3 + $0x160] sm:$0xf] }
   0x6   :  { %v351_v22 = vand.u32 %v784_v14, %v929_v13  ;;  %v688_v23 = vor.u32 %v845_v19, %v685_v20  ;;  %v867_v24 = vld [vmem:[%s1279_s3 + $0x16c] sm:$0xf0]  ;;  %v865_v25 = vld [vmem:[%s1279_s3 + $0x164] sm:$0xf]  ;;  %v765_v26 = vld [vmem:[%s1279_s3 + $0x170] sm:$0xf0] }
   0x7   :  { %375 = vmatpush.bf16.msra.mxu1 %v348_v17  ;;  %v764_v27 = vor.u32 %v867_v24, %v763_v21  ;;  %v667_v28 = vld [vmem:[%s1279_s3 + $0xa0] sm:$0xf]  ;;  %v843_v29 = vld [vmem:[%s1279_s3 + $0xac] sm:$0xf0]  ;;  %v841_v30 = vld [vmem:[%s1279_s3 + $0xa4] sm:$0xf]  ;;  %v768_v31 = vor.u32 %v865_v25, %v765_v26 }
   0x8   :  { %401 = vmatpush.bf16.msra.mxu3 %v351_v22  ;;  %360 = vmatpush.bf16.msra.mxu0 %v684_v18  ;;  %v668_v32 = vor.u32 %v843_v29, %v667_v28  ;;  %v669_v33 = vld [vmem:[%s1279_s3 + $0xb0] sm:$0xf0]  ;;  %v747_v34 = vld [vmem:[%s1279_s3 + $0x140] sm:$0xf]  ;;  %v863_v35 = vld [vmem:[%s1279_s3 + $0x14c] sm:$0xf0] }
   0x9   :  { %386 = vmatpush.bf16.msra.mxu2 %v688_v23  ;;  %v672_v36 = vor.u32 %v841_v30, %v669_v33  ;;  %v861_v37 = vld [vmem:[%s1279_s3 + $0x144] sm:$0xf]  ;;  %v749_v38 = vld [vmem:[%s1279_s3 + $0x150] sm:$0xf0]  ;;  %v651_v39 = vld [vmem:[%s1279_s3 + $0x80] sm:$0xf]  ;;  %v748_v43 = vor.u32 %v863_v35, %v747_v34 }
   0xa   :  { %v839_v40 = vld [vmem:[%s1279_s3 + $0x8c] sm:$0xf0]  ;;  %v837_v41 = vld [vmem:[%s1279_s3 + $0x84] sm:$0xf]  ;;  %v653_v42 = vld [vmem:[%s1279_s3 + $0x90] sm:$0xf0]  ;;  %v752_v44 = vor.u32 %v861_v37, %v749_v38 }
   0xb   :  { %376 = vmatpush.bf16.msra.mxu1 %v764_v27  ;;  %v652_v45 = vor.u32 %v839_v40, %v651_v39  ;;  %v731_v46 = vld [vmem:[%s1279_s3 + $0x120] sm:$0xf]  ;;  %v859_v47 = vld [vmem:[%s1279_s3 + $0x12c] sm:$0xf0]  ;;  %v857_v48 = vld [vmem:[%s1279_s3 + $0x124] sm:$0xf]  ;;  %v656_v49 = vor.u32 %v837_v41, %v653_v42 }
   0xc   :  { %402 = vmatpush.bf16.msra.mxu3 %v768_v31  ;;  %361 = vmatpush.bf16.msra.mxu0 %v668_v32  ;;  %v733_v50 = vld [vmem:[%s1279_s3 + $0x130] sm:$0xf0]  ;;  %v635_v51 = vld [vmem:[%s1279_s3 + $0x60] sm:$0xf]  ;;  %v835_v52 = vld [vmem:[%s1279_s3 + $0x6c] sm:$0xf0]  ;;  %v732_v55 = vor.u32 %v859_v47, %v731_v46 }
   0xd   :  { %387 = vmatpush.bf16.msra.mxu2 %v672_v36  ;;  %v833_v53 = vld [vmem:[%s1279_s3 + $0x64] sm:$0xf]  ;;  %v637_v54 = vld [vmem:[%s1279_s3 + $0x70] sm:$0xf0]  ;;  %v715_v56 = vld [vmem:[%s1279_s3 + $0x100] sm:$0xf]  ;;  %v736_v59 = vor.u32 %v857_v48, %v733_v50  ;;  %v636_v60 = vor.u32 %v835_v52, %v635_v51 }
   0xe   :  { %v855_v57 = vld [vmem:[%s1279_s3 + $0x10c] sm:$0xf0]  ;;  %v787_v58 = vld [vmem:[%s1279_s3 + $0x188] sm:$0xf]  ;;  %v853_v61 = vld [vmem:[%s1279_s3 + $0x104] sm:$0xf]  ;;  %v640_v0 = vor.u32 %v833_v53, %v637_v54 }
   0xf   :  { %377 = vmatpush.bf16.msra.mxu1 %v748_v43  ;;  %v717_v62 = vld [vmem:[%s1279_s3 + $0x110] sm:$0xf0]  ;;  %v872_v63 = vld [vmem:[%s1279_s3 + $0x194] sm:$0xf0]  ;;  %v707_v1 = vld [vmem:[%s1279_s3 + $0xe8] sm:$0xf]  ;;  %v716_v7 = vor.u32 %v855_v57, %v715_v56 }
  0x10   :  { %403 = vmatpush.bf16.msra.mxu3 %v752_v44  ;;  %362 = vmatpush.bf16.msra.mxu0 %v652_v45  ;;  %v852_v2 = vld [vmem:[%s1279_s3 + $0xf4] sm:$0xf0]  ;;  %v788_v3 = vor.u32 %v872_v63, %v787_v58  ;;  %v26_v4 = vld [vmem:[%s1280_s1] sm:$0x3]  ;;  %v831_v6 = vld [vmem:[%s1279_s3 + $0x4c] sm:$0xf0]  ;;  %v720_v10 = vor.u32 %v853_v61, %v717_v62 }
  0x11   :  { %388 = vmatpush.bf16.msra.mxu2 %v656_v49  ;;  %v619_v5 = vld [vmem:[%s1279_s3 + $0x40] sm:$0xf]  ;;  %80 = vst [vmem:[#allocation1] ss:$9 sm:$0xff] %v26_v4  ;;  %v829_v8 = vld [vmem:[%s1279_s3 + $0x44] sm:$0xf]  ;;  %v708_v11 = vor.u32 %v852_v2, %v707_v1 }
  0x12   :  { %v621_v9 = vld [vmem:[%s1279_s3 + $0x50] sm:$0xf0]  ;;  %v354_v12 = vand.u32 %v788_v3, %v929_v13  ;;  %v620_v14 = vor.u32 %v831_v6, %v619_v5  ;;  %v691_v15 = vld [vmem:[%s1279_s3 + $0xc8] sm:$0xf]  ;;  %v848_v16 = vld [vmem:[%s1279_s3 + $0xd4] sm:$0xf0] }
  0x13   :  { %378 = vmatpush.bf16.msra.mxu1 %v732_v55  ;;  %v771_v17 = vld [vmem:[%s1279_s3 + $0x168] sm:$0xf]  ;;  %v624_v18 = vor.u32 %v829_v8, %v621_v9  ;;  %v868_v19 = vld [vmem:[%s1279_s3 + $0x174] sm:$0xf0]  ;;  %v603_v20 = vld [vmem:[%s1279_s3 + $0x20] sm:$0xf]  ;;  %v692_v25 = vor.u32 %v848_v16, %v691_v15 }
  0x14   :  { %404 = vmatpush.bf16.msra.mxu3 %v736_v59  ;;  %363 = vmatpush.bf16.msra.mxu0 %v636_v60  ;;  %v827_v21 = vld [vmem:[%s1279_s3 + $0x2c] sm:$0xf0]  ;;  %v825_v22 = vld [vmem:[%s1279_s3 + $0x24] sm:$0xf]  ;;  %v605_v23 = vld [vmem:[%s1279_s3 + $0x30] sm:$0xf0]  ;;  %v772_v30 = vor.u32 %v868_v19, %v771_v17 }
  0x15   :  { %389 = vmatpush.bf16.msra.mxu2 %v640_v0  ;;  %v675_v24 = vld [vmem:[%s1279_s3 + $0xa8] sm:$0xf]  ;;  %v844_v26 = vld [vmem:[%s1279_s3 + $0xb4] sm:$0xf0]  ;;  %v870_v27 = vld [vmem:[%s1279_s3 + $0x18c] sm:$0xf]  ;;  %v604_v31 = vor.u32 %v827_v21, %v603_v20  ;;  %v608_v34 = vor.u32 %v825_v22, %v605_v23 }
  0x16   :  { %v789_v28 = vld [vmem:[%s1279_s3 + $0x198] sm:$0xf0]  ;;  %v755_v32 = vld [vmem:[%s1279_s3 + $0x148] sm:$0xf]  ;;  %v864_v33 = vld [vmem:[%s1279_s3 + $0x154] sm:$0xf0]  ;;  %v676_v42 = vor.u32 %v844_v26, %v675_v24 }
  0x17   :  { %379 = vmatpush.bf16.msra.mxu1 %v716_v7  ;;  %v587_v35 = vld [vmem:[%s1279_s3] sm:$0xf]  ;;  %v823_v36 = vld [vmem:[%s1279_s3 + $0xc] sm:$0xf0]  ;;  %v821_v37 = vld [vmem:[%s1279_s3 + $0x4] sm:$0xf]  ;;  %v792_v41 = vor.u32 %v870_v27, %v789_v28  ;;  %v756_v43 = vor.u32 %v864_v33, %v755_v32 }
  0x18   :  { %405 = vmatpush.bf16.msra.mxu3 %v720_v10  ;;  %364 = vmatpush.bf16.msra.mxu0 %v620_v14  ;;  %v1093_v29 = vld [vmem:[#allocation1 + $0x9] sm:$0xff]  ;;  %v589_v38 = vld [vmem:[%s1279_s3 + $0x10] sm:$0xf0]  ;;  %v709_v40 = vld [vmem:[%s1279_s3 + $0xf8] sm:$0xf0]  ;;  %v588_v44 = vor.u32 %v823_v36, %v587_v35  ;;  %vm569_vm5 = vcmask 1040384  }
  0x19   :  { %390 = vmatpush.bf16.msra.mxu2 %v624_v18  ;;  %v850_v39 = vld [vmem:[%s1279_s3 + $0xec] sm:$0xf]  ;;  %v659_v45 = vld [vmem:[%s1279_s3 + $0x88] sm:$0xf]  ;;  %v840_v46 = vld [vmem:[%s1279_s3 + $0x94] sm:$0xf0]  ;;  %v592_v47 = vor.u32 %v821_v37, %v589_v38  ;;  %v357_v51 = vand.u32 %v792_v41, %v929_v13 }
  0x1a   :  { %793 = vmatmul.msk.bf16.vlgmr.msra.gmra.mxu1 %vm340_vm2, %v1093_v29  ;;  %v712_v48 = vor.u32 %v850_v39, %v709_v40  ;;  %v739_v49 = vld [vmem:[%s1279_s3 + $0x128] sm:$0xf]  ;;  %v860_v50 = vld [vmem:[%s1279_s3 + $0x134] sm:$0xf0]  ;;  %v846_v52 = vld [vmem:[%s1279_s3 + $0xcc] sm:$0xf]  ;;  %v660_v55 = vor.u32 %v840_v46, %v659_v45 }
  0x1b   :  { %411 = vmatpush.bf16.msrb.mxu1 %v708_v11  ;;  %794 = vmatmul.msk.bf16.vlgmr.msra.gmra.mxu3 %vm340_vm2, %v1093_v29  ;;  %v693_v53 = vld [vmem:[%s1279_s3 + $0xd8] sm:$0xf0]  ;;  %v866_v54 = vld [vmem:[%s1279_s3 + $0x16c] sm:$0xf]  ;;  %v799_v13 = vld [vmem:[%s1281_s2] sm:$0xf]  ;;  %v740_v58 = vor.u32 %v860_v50, %v739_v49 }
  0x1c   :  { %427 = vmatpush.bf16.msrb.mxu3 %v354_v12  ;;  %365 = vmatpush.bf16.msra.mxu0 %v604_v31  ;;  %v773_v56 = vld [vmem:[%s1279_s3 + $0x178] sm:$0xf0]  ;;  %v819_v57 = vld [vmem:[%s1281_s2 + $0xc] sm:$0x10]  ;;  %v643_v59 = vld [vmem:[%s1279_s3 + $0x68] sm:$0xf]  ;;  %v696_v62 = vor.u32 %v846_v52, %v693_v53 }
  0x1d   :  { %391 = vmatpush.bf16.msra.mxu2 %v608_v34  ;;  %v836_v60 = vld [vmem:[%s1279_s3 + $0x74] sm:$0xf0]  ;;  %v1160_v61 = vld [vmem:[#allocation1] sm:$0xff]  ;;  %v723_v63 = vld [vmem:[%s1279_s3 + $0x108] sm:$0xf]  ;;  %v776_v1 = vor.u32 %v866_v54, %v773_v56  ;;  %v800_v4 = vor.u32 %v819_v57, %v799_v13  ;;  %vm571_vm6 = vcmask 1042434  }
  0x1e   :  { %v856_v0 = vld [vmem:[%s1279_s3 + $0x114] sm:$0xf0]  ;;  %v842_v2 = vld [vmem:[%s1279_s3 + $0xac] sm:$0xf]  ;;  %v677_v3 = vld [vmem:[%s1279_s3 + $0xb8] sm:$0xf0]  ;;  %v644_v5 = vor.u32 %v836_v60, %v643_v59 }
  0x1f   :  { %412 = vmatpush.bf16.msrb.mxu1 %v692_v25  ;;  %v862_v6 = vld [vmem:[%s1279_s3 + $0x14c] sm:$0xf]  ;;  %v757_v7 = vld [vmem:[%s1279_s3 + $0x158] sm:$0xf0]  ;;  %v724_v8 = vor.u32 %v856_v0, %v723_v63  ;;  %v627_v9 = vld [vmem:[%s1279_s3 + $0x48] sm:$0xf]  ;;  %v680_v11 = vor.u32 %v842_v2, %v677_v3 }
  0x20   :  { %428 = vmatpush.bf16.msrb.mxu3 %v772_v30  ;;  %366 = vmatpush.bf16.msra.mxu0 %v588_v44  ;;  %v832_v10 = vld [vmem:[%s1279_s3 + $0x54] sm:$0xf0]  ;;  %v838_v12 = vld [vmem:[%s1279_s3 + $0x8c] sm:$0xf]  ;;  %v661_v14 = vld [vmem:[%s1279_s3 + $0x98] sm:$0xf0]  ;;  %v760_v15 = vor.u32 %v862_v6, %v757_v7 }
  0x21   :  { %392 = vmatpush.bf16.msra.mxu2 %v592_v47  ;;  %v485_v16 = vsel %vm483_vm3, %v800_v4, 0  ;;  %v818_v17 = vld [vmem:[%s1281_s2 + $0xc] sm:$0xf]  ;;  %v809_v18 = vld [vmem:[%s1281_s2 + $0x18] sm:$0x10]  ;;  %v628_v19 = vor.u32 %v832_v10, %v627_v9  ;;  %v664_v26 = vor.u32 %v838_v12, %v661_v14  ;;  %vm573_vm7 = vcmask 1041408  }
  0x22   :  { %v858_v20 = vld [vmem:[%s1279_s3 + $0x12c] sm:$0xf]  ;;  %v741_v21 = vld [vmem:[%s1279_s3 + $0x138] sm:$0xf0]  ;;  %v812_v22 = vor.u32 %v818_v17, %v809_v18  ;;  %v611_v23 = vld [vmem:[%s1279_s3 + $0x28] sm:$0xf] }
  0x23   :  { %413 = vmatpush.bf16.msrb.mxu1 %v676_v42  ;;  %367 = vmatmul.bf16.vlgmr.msra.gmra.mxu0 %v1160_v61  ;;  %v828_v24 = vld [vmem:[%s1279_s3 + $0x34] sm:$0xf0]  ;;  %v834_v25 = vld [vmem:[%s1279_s3 + $0x6c] sm:$0xf]  ;;  %v807_v27 = vld [vmem:[%s1281_s2 + $0x8] sm:$0xf]  ;;  %v744_v31 = vor.u32 %v858_v20, %v741_v21 }
  0x24   :  { %429 = vmatpush.bf16.msrb.mxu3 %v756_v43  ;;  %437 = vmatpush.bf16.msrb.mxu0 %v712_v48  ;;  %v820_v28 = vld [vmem:[%s1281_s2 + $0x14] sm:$0x10]  ;;  %v494_v30 = vsel %vm483_vm3, %v812_v22, 0  ;;  %v645_v32 = vld [vmem:[%s1279_s3 + $0x78] sm:$0xf0]  ;;  %v612_v35 = vor.u32 %v828_v24, %v611_v23 }
  0x25   :  { %453 = vmatpush.bf16.msrb.mxu2 %v357_v51  ;;  %v817_v33 = vld [vmem:[%s1281_s2 + $0x4] sm:$0xf]  ;;  %v801_v34 = vld [vmem:[%s1281_s2 + $0x10] sm:$0x10]  ;;  %v854_v36 = vld [vmem:[%s1279_s3 + $0x10c] sm:$0xf]  ;;  %v808_v40 = vor.u32 %v820_v28, %v807_v27  ;;  %v648_v41 = vor.u32 %v834_v25, %v645_v32 }
  0x26   :  { %393 = vmatmul.bf16.vlgmr.msra.gmra.mxu2 %v1160_v61  ;;  %v725_v37 = vld [vmem:[%s1279_s3 + $0x118] sm:$0xf0]  ;;  %v595_v38 = vld [vmem:[%s1279_s3 + $0x8] sm:$0xf]  ;;  %v824_v39 = vld [vmem:[%s1279_s3 + $0x14] sm:$0xf0]  ;;  %v804_v42 = vor.u32 %v817_v33, %v801_v34 }
  0x27   :  { %414 = vmatpush.bf16.msrb.mxu1 %v660_v55  ;;  %v728_v43 = vor.u32 %v854_v36, %v725_v37  ;;  %v830_v44 = vld [vmem:[%s1279_s3 + $0x4c] sm:$0xf]  ;;  %v629_v45 = vld [vmem:[%s1279_s3 + $0x58] sm:$0xf0]  ;;  %v596_v46 = vor.u32 %v824_v39, %v595_v38  ;;  %v491_v47 = vsel %vm483_vm3, %v808_v40, 0 }
  0x28   :  { %430 = vmatpush.bf16.msrb.mxu3 %v740_v58  ;;  %438 = vmatpush.bf16.msrb.mxu0 %v696_v62  ;;  %v632_v48 = vor.u32 %v830_v44, %v629_v45  ;;  %v488_v49 = vsel %vm483_vm3, %v804_v42, 0  ;;  %v826_v50 = vld [vmem:[%s1279_s3 + $0x2c] sm:$0xf]  ;;  %v613_v51 = vld [vmem:[%s1279_s3 + $0x38] sm:$0xf0] }
  0x29   :  { %454 = vmatpush.bf16.msrb.mxu2 %v776_v1  ;;  %v616_v52 = vor.u32 %v826_v50, %v613_v51  ;;  %v822_v53 = vld [vmem:[%s1279_s3 + $0xc] sm:$0xf]  ;;  %v597_v54 = vld [vmem:[%s1279_s3 + $0x18] sm:$0xf0]  ;;  %v21_v55 = vld [vmem:[%s1282_s0] sm:$0x1] }
  0x2a   :  { %v600_v56 = vor.u32 %v822_v53, %v597_v54 }
  0x2b   :  { %415 = vmatpush.bf16.msrb.mxu1 %v644_v5 }
  0x2c   :  { %431 = vmatpush.bf16.msrb.mxu3 %v724_v8  ;;  %439 = vmatpush.bf16.msrb.mxu0 %v680_v11  ;;  %v548_v11 = vld [vmem:[%s1283_s4] sm:$0xf] }
  0x2d   :  { %455 = vmatpush.bf16.msrb.mxu2 %v760_v15  ;;  %v552_v18 = vperm.slane %v548_v11, 2  ;;  %v553_v23 = vperm.slane %v548_v11, 3 }
  0x2f   :  { %795 = vmatmul.msk.bf16.vlgmr.msrb.gmra.mxu3 %vm340_vm2, %v1093_v29  ;;  %416 = vmatpush.bf16.msrb.mxu1 %v628_v19 }
  0x30   :  { %503 = vmatpush.bf16.msra.mxu3 %v485_v16  ;;  %440 = vmatpush.bf16.msrb.mxu0 %v664_v26  ;;  %v551_v16 = vperm.slane %v548_v11, 1  ;;  %v550_v26 = vperm.slane %v548_v11, 0 }
  0x31   :  { %456 = vmatpush.bf16.msrb.mxu2 %v744_v31 }
  0x33   :  { %417 = vmatpush.bf16.msrb.mxu1 %v612_v35 }
  0x34   :  { %542 = vmatpush.bf16.msrb.mxu3 %v494_v30  ;;  %441 = vmatpush.bf16.msrb.mxu0 %v648_v41  ;;  %v576_v30 = vlaneseq }
  0x35   :  { %457 = vmatpush.bf16.msrb.mxu2 %v728_v43 }
  0x36   :  { %vm578_vm8 = vcmp.lt.s32.totalorder %v576_v30, 512 }
  0x37   :  { %418 = vmatpush.bf16.msrb.mxu1 %v596_v46 }
  0x38   :  { %796 = vmatmul.msk.bf16.vlgmr.msrb.gmra.mxu2 %vm340_vm2, %v1093_v29  ;;  %442 = vmatpush.bf16.msrb.mxu0 %v632_v48 }
  0x39   :  { %529 = vmatpush.bf16.msra.mxu2 %v491_v47 }
  0x3a   :  { %419 = vmatmul.bf16.vlgmr.msrb.gmra.mxu1 %v1160_v61 }
  0x3b   :  { %516 = vmatpush.bf16.msra.mxu1 %v488_v49 }
  0x3c   :  { %443 = vmatpush.bf16.msrb.mxu0 %v616_v52 }
  0x3f   :  { %813 = vmatmul.msk.bf16.vlgmr.msra.gmra.mxu3 %vm479_vm4, %v21_v55 }
  0x40   :  { %444 = vmatpush.bf16.msrb.mxu0 %v600_v56 }
  0x43   :  { %445 = vmatmul.bf16.vlgmr.msrb.gmra.mxu0 %v1160_v61 }
  0x48   :  { %815 = vmatmul.msk.bf16.vlgmr.msra.gmra.mxu2 %vm479_vm4, %v21_v55 }
  0x4a   :  { %814 = vmatmul.msk.bf16.vlgmr.msra.gmra.mxu1 %vm479_vm4, %v21_v55 }
  0x4f   :  { %816 = vmatmul.msk.bf16.vlgmr.msrb.gmra.mxu3 %vm479_vm4, %v21_v55 }
  0x97   :  { %v381_v29 = vpop.f32.mrf.mxu1 }
  0x9e   :  { %v407_v13 = vpop.f32.mrf.mxu3 }
  0x9f   :  { %v383_v57 = vpop.f32.mrf.mxu1 }
  0xa0   :  { %v368_v58 = vpop.f32.mrf.mxu0 }
  0xa1   :  { %v382_v20 = vadd.f32 %v381_v29, %v368_v58 }
  0xa6   :  { %v409_v59 = vpop.f32.mrf.mxu3 }
  0xa8   :  { %v370_v62 = vpop.f32.mrf.mxu0 }
  0xa9   :  { %v394_v60 = vpop.f32.mrf.mxu2 }
  0xaa   :  { %v408_v10 = vadd.f32 %v407_v13, %v394_v60 }
  0xb1   :  { %v396_v0 = vpop.f32.mrf.mxu2 }
  0xb2   :  { %v433_v63 = vpop.f32.mrf.mxu3 }
  0xb7   :  { %v420_v1 = vpop.f32.mrf.mxu1 }
  0xb8   :  { %v434_v14 = vadd.f32 %v433_v63, %v420_v1 }
  0xba   :  { %v435_v2 = vpop.f32.mrf.mxu3 }
  0xbb   :  { %v459_v3 = vpop.f32.mrf.mxu2 }
  0xbf   :  { %v422_v4 = vpop.f32.mrf.mxu1 }
  0xc0   :  { %v446_v5 = vpop.f32.mrf.mxu0 }
  0xc1   :  { %v460_v21 = vadd.f32 %v459_v3, %v446_v5 }
  0xc2   :  { %v505_v6 = vpop.f32.mrf.mxu3 }
  0xc3   :  { %v461_v7 = vpop.f32.mrf.mxu2  ;;  %v506_v25 = vadd.f32 %v505_v6, %v382_v20 }
  0xc5   :  { %v558_v34 = vadd.f32 %v550_v26, %v506_v25 }
  0xc7   :  { %v518_v61 = vpop.f32.mrf.mxu1 }
  0xc8   :  { %v448_v8 = vpop.f32.mrf.mxu0  ;;  %v519_v15 = vadd.f32 %v518_v61, %v408_v10 }
  0xca   :  { %v507_v9 = vpop.f32.mrf.mxu3  ;;  %v559_v22 = vadd.f32 %v551_v16, %v519_v15 }
  0xcb   :  { %v531_v12 = vpop.f32.mrf.mxu2 }
  0xcc   :  { %v532_v17 = vadd.f32 %v531_v12, %v434_v14  ;;  %v566_v32 = vrot.slane %v559_v22, 7 }
  0xce   :  { %v560_v27 = vadd.f32 %v552_v18, %v532_v17  ;;  %v570_v37 = vsel %vm569_vm5, %v558_v34, %v566_v32 }
  0xcf   :  { %v520_v19 = vpop.f32.mrf.mxu1 }
  0xd0   :  { %v567_v35 = vrot.slane %v560_v27, 6 }
  0xd2   :  { %v544_v24 = vpop.f32.mrf.mxu3 }
  0xd3   :  { %v545_v28 = vadd.f32 %v544_v24, %v460_v21  ;;  %v533_v31 = vpop.f32.mrf.mxu2 }
  0xd5   :  { %v561_v33 = vadd.f32 %v553_v23, %v545_v28 }
  0xd7   :  { %v568_v36 = vrot.slane %v561_v33, 5 }
  0xd9   :  { %v572_v38 = vsel %vm571_vm6, %v567_v35, %v568_v36 }
  0xda   :  { %v574_v39 = vsel %vm573_vm7, %v570_v37, %v572_v38  ;;  %v546_v40 = vpop.f32.mrf.mxu3 }
  0xdb   :  { %580 = vst.msk [vmem:[%s1284_s5] sm:$0xf] %vm578_vm8, %v574_v39 }

// kernel: _lambda_.3
= control target key start
LH: loop header
LB: loop body
LE: loop exit
PB: predicated region body
PF: predicated region fallthrough
CT: control target
= control target key end

     0   :  { %vm38_vm0 = vcmask 1043456   ;;  %vm34_vm1 = vcmask 195584   ;;  %vm70_vm2 = vcmask 1041408   ;;  %s134_s1 = inlined_call_operand.vmem [shape: bf16[24,128], index: 1, kind: input, shape index: {}]   ;;  %s135_s0 = inlined_call_operand.vmem [shape: bf16[12,24], index: 0, kind: input, shape index: {}]   ;;  %s136_s2 = inlined_call_operand.vmem [shape: f32[1,3,128], index: 2, kind: input, shape index: {}]   ;;  %s137_s3 = inlined_call_operand.vmem [shape: f32[1,3,128], index: 3, kind: output, shape index: {}]  }
   0x1   :  { %v19_v0 = vld [vmem:[%s134_s1 + $0x8] sm:$0xf]  ;;  %v95_v4 = vld [vmem:[%s134_s1] sm:$0xff] }
   0x2   :  { %v30_v1 = vunpack.c.l.b16 %v19_v0  ;;  %v87_v5 = vld [vmem:[%s135_s0] sm:$0xf]  ;;  %v94_v6 = vld [vmem:[%s135_s0] sm:$0x30] }
   0x3   :  { %v88_v7 = vor.u32 %v94_v6, %v87_v5  ;;  %v56_v8 = vld [vmem:[%s136_s2] sm:$0x7] }
   0x4   :  { %v32_v2 = vpack.c.b16 %v30_v1, %v30_v1  ;;  %v59_v10 = vperm.slane %v56_v8, 1  ;;  %v65_v11 = vperm.slane %v56_v8, 2  ;;  %v57_v13 = vperm.slane %v56_v8, 0 }
   0x6   :  { %v40_v3 = vsel %vm38_vm0, %v32_v2, 0 }
   0x7   :  { %48 = vmatpush.bf16.msra.mxu0 %v40_v3 }
   0xb   :  { %49 = vmatpush.bf16.msra.mxu0 %v95_v4 }
   0xe   :  { %93 = vmatmul.msk.bf16.vlgmr.msra.gmra.mxu0 %vm34_vm1, %v88_v7 }
  0x8b   :  { %v51_v9 = vpop.f32.mrf.mxu0 }
  0x8c   :  { %v60_v12 = vmul.f32 %v59_v10, %v51_v9  ;;  %v66_v14 = vmul.f32 %v65_v11, %v51_v9  ;;  %v58_v18 = vmul.f32 %v57_v13, %v51_v9 }
  0x8e   :  { %v62_v15 = vrot.slane %v60_v12, 3  ;;  %v71_v19 = vrot.slane %v66_v14, 6 }
  0x90   :  { %v64_v21 = vadd.f32 %v62_v15, %v58_v18 }
  0x93   :  { %v53_v16 = vpop.f32.mrf.mxu0 }
  0x94   :  { %v67_v17 = vmul.f32 %v65_v11, %v53_v16  ;;  %v77_v24 = vrot.slane %v53_v16, 1 }
  0x96   :  { %v72_v20 = vrot.slane %v67_v17, 6 }
  0x98   :  { %v73_v22 = vsel %vm70_vm2, %v71_v19, %v72_v20 }
  0x99   :  { %v75_v23 = vadd.f32 %v73_v22, %v64_v21 }
  0x9b   :  { %v79_v25 = vadd.f32 %v77_v24, %v75_v23 }
  0x9d   :  { %80 = vst [vmem:[%s137_s3] sm:$0x7] %v79_v25 }

</bundles_post_ra>
